<compile_context>
chip_gen: v6e
topology: v6e:2x2x1
jax: 0.10.0
libtpu: 0.0.40
codegen_flags: <defaults>
</compile_context>

<pallas_src>
import math

import jax
import jax.numpy as jnp
from jax.experimental import pallas as pl
from jax.experimental.pallas import tpu as pltpu


_LANE = 128
_TILE_BYTES = 2 * 1024 * 1024       # ~2 MiB tiles: ~85% of HBM roofline, fits all gens
_VMEM_LIMIT = 32 * 1024 * 1024      # explicit scoped-VMEM budget (ok on v5e/v6e/v7x)


def make_positional_encoding_table(d_model: int, max_len: int = 100,
                                   dtype=jnp.float32) -> jnp.ndarray:
    """Build the fixed sinusoidal pe table once, shape (max_len, d_model), in model dtype."""
    position = jnp.arange(0, max_len, dtype=jnp.float32)[:, None]           # (max_len, 1)
    div_term = jnp.exp(
        jnp.arange(0, d_model, 2, dtype=jnp.float32) * -(math.log(10000.0) / d_model)
    )                                                                         # (ceil(d/2),)
    pe = jnp.zeros((max_len, d_model), dtype=jnp.float32)
    pe = pe.at[:, 0::2].set(jnp.sin(position * div_term))
    if d_model % 2 == 1:
        pe = pe.at[:, 1::2].set(jnp.cos(position * div_term[:-1]))
    else:
        pe = pe.at[:, 1::2].set(jnp.cos(position * div_term))
    return pe.astype(dtype)


def _pe_add_batched_kernel(x_ref, pe_ref, o_ref):
    # x_ref / o_ref: (TB, rows, 128); pe_ref: (rows, 128), VMEM-resident for the whole grid.
    o_ref[...] = x_ref[...] + pe_ref[...][None]


def _pe_add_rowtiled_kernel(x_ref, pe_ref, o_ref):
    # x_ref / pe_ref / o_ref: (TR, 128); batch dim squeezed out of the refs.
    o_ref[...] = x_ref[...] + pe_ref[...]


def _sublane_pack(itemsize: int) -> int:
    # Sub-32-bit dtypes pack along sublanes: f32 -> 8, bf16/f16 -> 16, int8/fp8 -> 32.
    return max(8, 32 // itemsize)


def positional_encoding(x: jnp.ndarray, pe_table: jnp.ndarray) -> jnp.ndarray:
    """x: (B, S, D); pe_table: (max_len, D). Returns x + pe[:S] (same shape/dtype as x)."""
    B, S, D = x.shape
    max_len, Dp = pe_table.shape
    if S > max_len:
        raise ValueError(f"seq_len={S} exceeds pe table max_len={max_len}")
    if Dp != D:
        raise ValueError(f"d_model mismatch: x has {D}, pe table has {Dp}")

    pe_slice = pe_table[:S, :]
    if pe_slice.dtype != x.dtype:
        # Prefer building pe_table in the model dtype up front; this is a fallback cast.
        pe_slice = pe_slice.astype(x.dtype)

    itemsize = jnp.dtype(x.dtype).itemsize
    L = S * D
    Lp = ((L + _LANE - 1) // _LANE) * _LANE        # pad flat length to a lane multiple
    rows = Lp // _LANE

    x_flat = x.reshape(B, L)
    pe_flat = pe_slice.reshape(L)
    if Lp != L:
        x_flat = jnp.pad(x_flat, ((0, 0), (0, Lp - L)))
        pe_flat = jnp.pad(pe_flat, ((0, Lp - L),))
    x2 = x_flat.reshape(B, rows, _LANE)
    pe2 = pe_flat.reshape(rows, _LANE)

    per_batch_bytes = rows * _LANE * itemsize

    if per_batch_bytes <= _TILE_BYTES:
        # Common case: per-batch slab is small (pe <= max_len*d_model). Fold several
        # batch elements per grid step; pe is one resident block fetched exactly once.
        tb = min(B, max(1, _TILE_BYTES // per_batch_bytes))
        grid = (pl.cdiv(B, tb),)
        out2 = pl.pallas_call(
            _pe_add_batched_kernel,
            out_shape=jax.ShapeDtypeStruct((B, rows, _LANE), x.dtype),
            grid_spec=pltpu.PrefetchScalarGridSpec(
                num_scalar_prefetch=0,
                grid=grid,
                in_specs=[
                    pl.BlockSpec((tb, rows, _LANE), lambda i: (i, 0, 0)),
                    # Constant block index -> Pallas fetches pe once, keeps it resident.
                    pl.BlockSpec((rows, _LANE), lambda i: (0, 0)),
                ],
                out_specs=pl.BlockSpec((tb, rows, _LANE), lambda i: (i, 0, 0)),
            ),
            compiler_params=pltpu.CompilerParams(
                dimension_semantics=("parallel",),
                vmem_limit_bytes=_VMEM_LIMIT,
            ),
        )(x2, pe2)
    else:
        # Large per-batch slab: tile rows (~2 MiB, multiple of the dtype's sublane
        # packing). Batch innermost ("arbitrary") so pe's block index (r, 0) is
        # constant across consecutive steps and its DMA is skipped across batch.
        pack = _sublane_pack(itemsize)
        tr = max(pack, ((_TILE_BYTES // (_LANE * itemsize)) // pack) * pack)
        grid = (pl.cdiv(rows, tr), B)   # ragged last row block handled by Pallas
        out2 = pl.pallas_call(
            _pe_add_rowtiled_kernel,
            out_shape=jax.ShapeDtypeStruct((B, rows, _LANE), x.dtype),
            grid_spec=pltpu.PrefetchScalarGridSpec(
                num_scalar_prefetch=0,
                grid=grid,
                in_specs=[
                    pl.BlockSpec((pl.Squeezed(), tr, _LANE), lambda r, b: (b, r, 0)),
                    pl.BlockSpec((tr, _LANE), lambda r, b: (r, 0)),
                ],
                out_specs=pl.BlockSpec((pl.Squeezed(), tr, _LANE), lambda r, b: (b, r, 0)),
            ),
            compiler_params=pltpu.CompilerParams(
                dimension_semantics=("parallel", "arbitrary"),
                vmem_limit_bytes=_VMEM_LIMIT,
            ),
        )(x2, pe2)

    out_flat = out2.reshape(B, Lp)
    if Lp != L:
        out_flat = out_flat[:, :L]
    return out_flat.reshape(B, S, D)


if __name__ == "__main__":
    key0, key1 = jax.random.split(jax.random.PRNGKey(0))

    # Test 1: shapes implied by the module (S*D divisible by 128 -> no padding path).
    batch, seq_len, d_model, max_len = 2, 8, 32, 100
    x = jax.random.normal(key0, (batch, seq_len, d_model), dtype=jnp.float32)
    pe_table = make_positional_encoding_table(d_model, max_len, dtype=x.dtype)
    out = jax.block_until_ready(positional_encoding(x, pe_table))
    ref = x + pe_table[None, :seq_len, :]
    assert out.shape == x.shape and out.dtype == x.dtype
    assert jnp.allclose(out, ref, atol=1e-6), "mismatch vs reference (aligned path)"

    # Test 2: odd d_model and S*D not a multiple of 128 -> lane-padding path.
    batch2, seq2, dmod2 = 3, 5, 25
    x2 = jax.random.normal(key1, (batch2, seq2, dmod2), dtype=jnp.float32)
    pe_table2 = make_positional_encoding_table(dmod2, max_len, dtype=x2.dtype)
    out2 = jax.block_until_ready(positional_encoding(x2, pe_table2))
    ref2 = x2 + pe_table2[None, :seq2, :]
    assert out2.shape == x2.shape and out2.dtype == x2.dtype
    assert jnp.allclose(out2, ref2, atol=1e-6), "mismatch vs reference (padded path)"

    print("KERNEL_OK")
</pallas_src>

<mosaic_0001>
module attributes {stable_mosaic.version = 11 : i64} {
  func.func @_pe_add_batched_kernel(%arg0: i32, %arg1: memref<2x2x128xf32, #tpu.memory_space<vmem>>, %arg2: memref<2x128xf32, #tpu.memory_space<vmem>>, %arg3: memref<2x2x128xf32, #tpu.memory_space<vmem>>) attributes {dimension_semantics = [#tpu.dimension_semantics<parallel>], iteration_bounds = array<i64: 1>, scalar_prefetch = 0 : i64, scratch_operands = 0 : i64, tpu.core_type = #tpu.core_type<tc>, window_params = [{transform_indices = @transform_0, window_bounds = array<i64: 2, 2, 128>}, {pipeline_mode = #tpu.pipeline_mode<synchronous>, transform_indices = @transform_1, window_bounds = array<i64: 2, 128>}, {transform_indices = @transform_2, window_bounds = array<i64: 2, 2, 128>}]} {
    %c0 = arith.constant 0 : index
    %c0_0 = arith.constant 0 : index
    %c0_1 = arith.constant 0 : index
    %0 = vector.load %arg1[%c0, %c0_0, %c0_1] : memref<2x2x128xf32, #tpu.memory_space<vmem>>, vector<2x2x128xf32>
    %c0_2 = arith.constant 0 : index
    %c0_3 = arith.constant 0 : index
    %1 = vector.load %arg2[%c0_2, %c0_3] : memref<2x128xf32, #tpu.memory_space<vmem>>, vector<2x128xf32>
    %2 = vector.shape_cast %1 : vector<2x128xf32> to vector<1x2x128xf32>
    %3 = vector.broadcast %2 : vector<1x2x128xf32> to vector<2x2x128xf32>
    %4 = arith.addf %0, %3 : vector<2x2x128xf32>
    %c0_4 = arith.constant 0 : index
    %c0_5 = arith.constant 0 : index
    %c0_6 = arith.constant 0 : index
    %5 = vector.load %arg3[%c0_4, %c0_5, %c0_6] : memref<2x2x128xf32, #tpu.memory_space<vmem>>, vector<2x2x128xf32>
    tpu.vector_store %arg3[%c0_4, %c0_5, %c0_6], %4 {strides = array<i32>} : memref<2x2x128xf32, #tpu.memory_space<vmem>>, vector<2x2x128xf32>,
    return
  }
  func.func @transform_0(%arg0: i32) -> (i32, i32, i32) {
    %c0_i32 = arith.constant 0 : i32
    %c0_i32_0 = arith.constant 0 : i32
    %c0_i32_1 = arith.constant 0 : i32
    return %arg0, %c0_i32, %c0_i32_0 : i32, i32, i32
  }
  func.func @transform_1(%arg0: i32) -> (i32, i32) {
    %c0_i32 = arith.constant 0 : i32
    %c0_i32_0 = arith.constant 0 : i32
    %c0_i32_1 = arith.constant 0 : i32
    return %c0_i32, %c0_i32_0 : i32, i32
  }
  func.func @transform_2(%arg0: i32) -> (i32, i32, i32) {
    %c0_i32 = arith.constant 0 : i32
    %c0_i32_0 = arith.constant 0 : i32
    %c0_i32_1 = arith.constant 0 : i32
    return %arg0, %c0_i32, %c0_i32_0 : i32, i32, i32
  }
}

</mosaic_0001>

<bundles_post_ra>
// kernel: tpu_custom_call.1
= control target key start
LH: loop header
LB: loop body
LE: loop exit
PB: predicated region body
PF: predicated region fallthrough
CT: control target
= control target key end

     0   :  { %7 = vsyncpa [#allocation3], 0  ;;  %s169_s0 = inlined_call_operand.hbm [shape: f32[2,2,128], index: 0, kind: input, shape index: {}]   ;;  %s170_s1 = inlined_call_operand.hbm [shape: f32[2,128], index: 1, kind: input, shape index: {}]   ;;  %s171_s2 = inlined_call_operand.hbm [shape: f32[2,2,128], index: 2, kind: output, shape index: {}]  }
   0x1   :  { %8 = vsyncpa [#allocation6], 0 }
   0x2   :  { %9 = vsyncpa [#allocation4], 0  ;;  %s134_s9 = smov [#allocation2]  }
   0x3   :  { %s15_s10 = sshll.u32 %s134_s9, 4  ;;  %s16_s10 = int_to_ptr.vmem [resolvable:$true] %s15_s10 }
   0x4   :  { %s76_s11 = scalar_lea.vmem %s16_s10, 64  ;;  %p81_p1 = scmp.lt.s32.totalorder %s16_s10, %s16_s10 }
   0x5   :  { %p77_p0 = scmp.ne.s32.totalorder %s16_s10, %s76_s11  ;;  %p82_p2 = scmp.lt.s32.totalorder %s76_s11, %s76_s11 }
   0x7   :  { %p83_p3 = por %p82_p2, %p81_p1 }
   0x9   :  { %p84_p4 = pnand %p83_p3, %p77_p0 }
   0xb   :  { %87 = shalt.err (!%p84_p4)
}
   0xc   :  { %s135_s12 = smov 32   ;;  %s136_s13 = smov 2  }
   0xd   :  { %21 = dma.hbm_to_vmem [thread:$0]  %s169_s0, 64, %s16_s10, [#allocation3], %s135_s12, %s135_s12, %s136_s13  }
   0xe   :  { %s137_s16 = smov [#allocation5]  }
   0xf   :  { %s28_s17 = sshll.u32 %s137_s16, 4  ;;  %s29_s17 = int_to_ptr.vmem [resolvable:$true] %s28_s17 }
  0x10   :  { %s96_s18 = scalar_lea.vmem %s29_s17, 32  ;;  %p101_p6 = scmp.lt.s32.totalorder %s29_s17, %s29_s17 }
  0x11   :  { %p97_p5 = scmp.ne.s32.totalorder %s29_s17, %s96_s18  ;;  %p102_p7 = scmp.lt.s32.totalorder %s96_s18, %s96_s18 }
  0x13   :  { %p103_p8 = por %p102_p7, %p101_p6 }
  0x15   :  { %p104_p9 = pnand %p103_p8, %p97_p5 }
  0x17   :  { %107 = shalt.err (!%p104_p9)
}
  0x18   :  { %31 = dma.hbm_to_vmem [thread:$0]  %s170_s1, 32, %s29_s17, [#allocation6]  }
  0x19   :  { %128 = dma.done.wait [#allocation3], 64  }
  0x1a   :  { %129 = vsyncadd [#allocation3], 4294967232 }
  0x1b   :  { %130 = dma.done.wait [#allocation6], 32  }
  0x1c   :  { %131 = vsyncadd [#allocation6], 4294967264  ;;  %s138_s21 = smov [#allocation7]   ;;  %v38_v0 = vld [vmem:[#allocation2] sm:$0x3] }
  0x1d   :  { %s50_s0 = sshll.u32 %s138_s21, 4  ;;  %v40_v1 = vld [vmem:[#allocation5] sm:$0x3]  ;;  %v39_v2 = vld [vmem:[#allocation2 + $0x2] sm:$0x3]  ;;  %s51_s0 = int_to_ptr.vmem [resolvable:$true] %s50_s0 }
  0x1e   :  { %v41_v3 = vadd.f32 %v40_v1, %v38_v0  ;;  %v42_v4 = vadd.f32 %v40_v1, %v39_v2  ;;  %s108_s22 = scalar_lea.vmem %s51_s0, 64  ;;  %p113_p11 = scmp.lt.s32.totalorder %s51_s0, %s51_s0 }
  0x1f   :  { %p109_p10 = scmp.ne.s32.totalorder %s51_s0, %s108_s22  ;;  %p114_p12 = scmp.lt.s32.totalorder %s108_s22, %s108_s22 }
  0x20   :  { %43 = vst [vmem:[#allocation7] sm:$0x3] %v41_v3  ;;  %44 = vst [vmem:[#allocation7 + $0x2] sm:$0x3] %v42_v4 }
  0x21   :  { %p115_p13 = por %p114_p12, %p113_p11 }
  0x23   :  { %p116_p0 = pnand %p115_p13, %p109_p10 }
  0x25   :  { %119 = shalt.err (!%p116_p0)
}
  0x26   :  { %56 = dma.vmem_to_hbm [thread:$0]  %s51_s0, 64, %s171_s2, [#allocation4], %s135_s12, %s135_s12, %s136_s13  }
  0x27   :  { %132 = dma.done.wait [#allocation4], 64  }
  0x28   :  { %133 = vsyncadd [#allocation4], 4294967232 }
  0x29   :  { %60 = vsyncpa [#allocation3], 1 }
  0x2a   :  { %61 = vsyncpa [#allocation6], 1 }
  0x2b   :  { %62 = vsyncpa [#allocation4], 1 }

</bundles_post_ra>
